<compile_context>
chip_gen: v7x
topology: tpu7x:2x2x1
jax: 0.10.0
libtpu: 0.0.40
codegen_flags: <defaults>
</compile_context>

<pallas_src>
import functools

import jax
import jax.numpy as jnp
from jax import lax
from jax.experimental import pallas as pl
from jax.experimental.pallas import tpu as pltpu

OUT_DIM = 3   # nn.Linear(input_dim, 3)
OUT_SUB = 8   # output rows padded to one sublane group


def _linear_kernel(x_ref, w_ref, b_ref, o_ref):
    # x_ref: (tb, D)   w_ref: (OUT_SUB, D)   b_ref: (OUT_SUB, 1)   o_ref: (OUT_SUB, tb)
    acc = lax.dot_general(
        w_ref[...], x_ref[...],
        dimension_numbers=(((1,), (1,)), ((), ())),   # contract D of both -> (OUT_SUB, tb)
        preferred_element_type=jnp.float32,
    )
    o_ref[...] = (acc + b_ref[...]).astype(o_ref.dtype)


def _round_up(n, m):
    return ((n + m - 1) // m) * m


@functools.partial(jax.jit, static_argnames=("block_b",))
def stacking_model_forward(x, weight, bias, *, block_b=4096):
    """x: (B, D) float32; weight: (3, D) as in nn.Linear; bias: (3,)."""
    B, D = x.shape
    out_dim = weight.shape[0]
    itemsize = jnp.dtype(x.dtype).itemsize

    # Tiny parameters: pad the 3 output rows up to one sublane group once, outside the
    # kernel. Both stay resident in VMEM across all grid steps.
    w_pad = jnp.zeros((OUT_SUB, D), x.dtype).at[:out_dim, :].set(weight)
    b_col = jnp.zeros((OUT_SUB, 1), x.dtype).at[:out_dim, 0].set(bias)

    # Batch tiling: single tile for small B; otherwise 128-aligned tiles with at least
    # two tiles so both v7x TensorCores get work.  x itself is NOT padded -- the last
    # (overhanging) block is boundary-padded by Pallas on read, and only the exactly
    # tiled (OUT_SUB, b_pad) output is allocated padded (<= tb-1 wasted columns).
    b8 = _round_up(B, 8)
    blk = max(128, _round_up(block_b, 128))
    if b8 <= blk:
        tb = b8
        n_tiles = 1
    else:
        tb = min(blk, _round_up(pl.cdiv(b8, 2), 128))
        n_tiles = pl.cdiv(b8, tb)
    b_pad = n_tiles * tb

    cost = pl.CostEstimate(
        flops=2 * B * D * out_dim,
        transcendentals=0,
        bytes_accessed=(x.size + w_pad.size + b_col.size + OUT_SUB * b_pad) * itemsize,
    )

    out_t = pl.pallas_call(
        _linear_kernel,
        out_shape=jax.ShapeDtypeStruct((OUT_SUB, b_pad), x.dtype),
        grid_spec=pl.GridSpec(
            grid=(n_tiles,),
            in_specs=[
                pl.BlockSpec((tb, D), lambda i: (i, 0)),       # x: new tile per step
                pl.BlockSpec((OUT_SUB, D), lambda i: (0, 0)),  # W (padded): resident
                pl.BlockSpec((OUT_SUB, 1), lambda i: (0, 0)),  # bias column: resident
            ],
            out_specs=pl.BlockSpec((OUT_SUB, tb), lambda i: (0, i)),
        ),
        compiler_params=pltpu.CompilerParams(
            # Batch tiles are independent -> shard across v7x's 2 TensorCores.
            dimension_semantics=("parallel",),
            # Double-buffered tiles need ~ (512 + 32) B/row * 2 ~= 4.5 MiB at tb=4096,
            # well under 32 MiB scoped VMEM on every generation (v7x physical = 64 MiB).
            vmem_limit_bytes=32 * 1024 * 1024,
        ),
        cost_estimate=cost,
    )(x, w_pad, b_col)

    # Tiny (3, B) slice + transpose back to the nn.Linear output layout (B, 3).
    return out_t[:out_dim, :B].T


if __name__ == "__main__":
    key = jax.random.PRNGKey(0)
    k_x, k_w, k_b = jax.random.split(key, 3)

    batch = 8
    input_dim = 32

    # Deterministic parameter init mimicking nn.Linear default:
    # U(-1/sqrt(fan_in), 1/sqrt(fan_in)) for both weight and bias.
    bound = 1.0 / (input_dim ** 0.5)
    weight = jax.random.uniform(k_w, (OUT_DIM, input_dim), jnp.float32,
                                minval=-bound, maxval=bound)
    bias = jax.random.uniform(k_b, (OUT_DIM,), jnp.float32,
                              minval=-bound, maxval=bound)
    x = jax.random.normal(k_x, (batch, input_dim), jnp.float32)

    y = stacking_model_forward(x, weight, bias)
    jax.block_until_ready(y)

    # Reference check against plain JAX linear.
    y_ref = x @ weight.T + bias
    assert y.shape == (batch, OUT_DIM)
    assert jnp.allclose(y, y_ref, atol=1e-5, rtol=1e-5), "mismatch vs reference"

    print("KERNEL_OK")
</pallas_src>

<mosaic_0001>
module attributes {stable_mosaic.version = 11 : i64} {
  func.func @_linear_kernel(%arg0: i32, %arg1: memref<8x32xf32, #tpu.memory_space<vmem>>, %arg2: memref<8x32xf32, #tpu.memory_space<vmem>>, %arg3: memref<8x1xf32, #tpu.memory_space<vmem>>, %arg4: memref<8x8xf32, #tpu.memory_space<vmem>>) attributes {dimension_semantics = [#tpu.dimension_semantics<parallel>], iteration_bounds = array<i64: 1>, scalar_prefetch = 0 : i64, scratch_operands = 0 : i64, tpu.core_type = #tpu.core_type<tc>, window_params = [{transform_indices = @transform_0, window_bounds = array<i64: 8, 32>}, {pipeline_mode = #tpu.pipeline_mode<synchronous>, transform_indices = @transform_1, window_bounds = array<i64: 8, 32>}, {pipeline_mode = #tpu.pipeline_mode<synchronous>, transform_indices = @transform_2, window_bounds = array<i64: 8, 1>}, {transform_indices = @transform_3, window_bounds = array<i64: 8, 8>}]} {
    %c0 = arith.constant 0 : index
    %c0_0 = arith.constant 0 : index
    %0 = vector.load %arg2[%c0, %c0_0] : memref<8x32xf32, #tpu.memory_space<vmem>>, vector<8x32xf32>
    %c0_1 = arith.constant 0 : index
    %c0_2 = arith.constant 0 : index
    %1 = vector.load %arg1[%c0_1, %c0_2] : memref<8x32xf32, #tpu.memory_space<vmem>>, vector<8x32xf32>
    %cst = arith.constant dense<0.000000e+00> : vector<8x8xf32>
    %2 = tpu.matmul %0, %1, %cst {dimension_numbers = #tpu.dot_dimension_numbers<[1], [1], [0], [0], [0, 0, 1, 0], [], []>} : vector<8x32xf32>, vector<8x32xf32>, vector<8x8xf32> -> vector<8x8xf32>
    %c0_3 = arith.constant 0 : index
    %c0_4 = arith.constant 0 : index
    %3 = vector.load %arg3[%c0_3, %c0_4] : memref<8x1xf32, #tpu.memory_space<vmem>>, vector<8x1xf32>
    %4 = vector.broadcast %3 : vector<8x1xf32> to vector<8x8xf32>
    %5 = arith.addf %2, %4 : vector<8x8xf32>
    %c0_5 = arith.constant 0 : index
    %c0_6 = arith.constant 0 : index
    %6 = vector.load %arg4[%c0_5, %c0_6] : memref<8x8xf32, #tpu.memory_space<vmem>>, vector<8x8xf32>
    tpu.vector_store %arg4[%c0_5, %c0_6], %5 {strides = array<i32>} : memref<8x8xf32, #tpu.memory_space<vmem>>, vector<8x8xf32>,
    return
  }
  func.func @transform_0(%arg0: i32) -> (i32, i32) {
    %c0_i32 = arith.constant 0 : i32
    %c0_i32_0 = arith.constant 0 : i32
    return %arg0, %c0_i32 : i32, i32
  }
  func.func @transform_1(%arg0: i32) -> (i32, i32) {
    %c0_i32 = arith.constant 0 : i32
    %c0_i32_0 = arith.constant 0 : i32
    %c0_i32_1 = arith.constant 0 : i32
    return %c0_i32, %c0_i32_0 : i32, i32
  }
  func.func @transform_2(%arg0: i32) -> (i32, i32) {
    %c0_i32 = arith.constant 0 : i32
    %c0_i32_0 = arith.constant 0 : i32
    %c0_i32_1 = arith.constant 0 : i32
    return %c0_i32, %c0_i32_0 : i32, i32
  }
  func.func @transform_3(%arg0: i32) -> (i32, i32) {
    %c0_i32 = arith.constant 0 : i32
    %c0_i32_0 = arith.constant 0 : i32
    return %c0_i32, %arg0 : i32, i32
  }
}

</mosaic_0001>

<bundles_post_ra>
// kernel: stacking_model_forward.1
= control target key start
LH: loop header
LB: loop body
LE: loop exit
PB: predicated region body
PF: predicated region fallthrough
CT: control target
= control target key end

     0   :  { %vm22_vm0 = vcmask 261120   ;;  %v118_v0 = vmov 0.0   ;;  %vm119_vm1 = vmmov 0   ;;  %v120_v4 = vmov 0   ;;  %s153_s0 = inlined_call_operand.vmem [shape: f32[8,32], index: 0, kind: input, shape index: {}]   ;;  %s154_s1 = inlined_call_operand.vmem [shape: f32[8,32], index: 1, kind: input, shape index: {}]   ;;  %s155_s2 = inlined_call_operand.vmem [shape: f32[8,1], index: 2, kind: input, shape index: {}]   ;;  %s156_s3 = inlined_call_operand.vmem [shape: f32[8,8], index: 3, kind: output, shape index: {}]  }
   0x1   :  { %109 = vmatprep.subr.mxu0 %v118_v0  ;;  %v15_v1 = vld [vmem:[%s153_s0] sm:$0xff]  ;;  %111 = vmatprep.mubr.msk.f32.mxu0 %vm119_vm1, %v118_v0  ;;  %vm99_vm2 = vcmask 64512  }
   0x2   :  { %v16_v2 = vld [vmem:[%s155_s2] sm:$0xff]  ;;  %110 = vmatpush3.xpose.msk.msra.mxu0 %vm22_vm0, %v15_v1  ;;  %117 = vset.pattern.permute.xlu0 %v120_v4 }
   0x3   :  { %v14_v3 = vld [vmem:[%s154_s1] sm:$0xff]  ;;  %19 = vperm.xlu0 %117, %v16_v2  }
   0x5   :  { %112 = vmatmul.mubr.msk.f32.vlgmr.msra.gmra.mrb[0].mxu0 %vm22_vm0, %v14_v3 }
  0x82   :  { %v20_v5 = vpop.permute.xlu0 %19 }
  0xd8   :  { %v95_v6 = vpop.f32.mrb[0].mxu0 }
  0xd9   :  { %v96_v7 = vadd.f32 %v95_v6, %v20_v5  ;;  %v113_v8 = vpop.f32.mrb[1].mxu0 }
  0xdb   :  { %100 = vst.msk [vmem:[%s156_s3] sm:$0xff] %vm99_vm2, %v96_v7 }

</bundles_post_ra>
